<compile_context>
chip_gen: v6e
topology: v6e:2x2x1
jax: 0.10.0
libtpu: 0.0.40
codegen_flags: <defaults>
</compile_context>

<pallas_src>
import functools
import math

import jax
import jax.numpy as jnp
from jax.experimental import pallas as pl
from jax.experimental.pallas import tpu as pltpu


def _round_up(x: int, m: int) -> int:
    return (x + m - 1) // m * m


def _choose_tile(dim: int, desired: int, align: int) -> int:
    """Largest tile <= desired that is a multiple of `align` and divides
    round_up(dim, align) (so padding never exceeds align-1 elements)."""
    padded = _round_up(max(dim, 1), align)
    if padded <= desired:
        return padded
    best = align
    t = align
    while t <= desired:
        if padded % t == 0:
            best = t
        t += align
    return best


def _plan_tiles(K: int, N: int, *, tn_desired: int, tk_desired: int):
    """Pick (tn, tk) and padded (Kp, Np) for the weight, independent of M."""
    tk = _choose_tile(K, tk_desired, 128)
    tn = _choose_tile(N, tn_desired, 128)
    Kp = _round_up(K, tk)
    Np = _round_up(N, tn)
    # Make sure the N axis contributes >= 2 parallel blocks when possible, so
    # small-batch calls (single M block) still spread over both v7x cores.
    if Np // tn < 2 and Np >= 256:
        tn = _choose_tile(N, Np // 2, 128)
        Np = _round_up(N, tn)
    return tn, tk, Kp, Np


def _linear_kernel(x_ref, w_ref, b_ref, o_ref):
    # x_ref: (TM, TK) bf16, w_ref: (TK, TN) bf16, b_ref: (1, TN) f32,
    # o_ref: (TM, TN) f32 -- resident across the K grid axis (accumulator).
    k = pl.program_id(2)

    @pl.when(k == 0)
    def _init():
        o_ref[...] = jnp.zeros_like(o_ref)

    # Single-pass MXU matmul, f32 accumulation.
    o_ref[...] += jnp.dot(x_ref[...], w_ref[...],
                          preferred_element_type=jnp.float32)

    @pl.when(k == pl.num_programs(2) - 1)
    def _finalize():
        o_ref[...] += b_ref[...]          # (1, TN) broadcasts over rows


@functools.partial(jax.jit,
                   static_argnames=("tm", "tn", "tk", "n_out", "compute_dtype"))
def _pallas_linear(x, w_padded, b_padded, *, tm, tn, tk, n_out, compute_dtype):
    M, K = x.shape
    Kp, Np = w_padded.shape
    Mp = _round_up(M, tm)

    xp = jnp.pad(x.astype(compute_dtype), ((0, Mp - M), (0, Kp - K)))
    grid = (Mp // tm, Np // tn, Kp // tk)

    out = pl.pallas_call(
        _linear_kernel,
        out_shape=jax.ShapeDtypeStruct((Mp, Np), jnp.float32),
        grid=grid,
        in_specs=[
            pl.BlockSpec((tm, tk), lambda i, j, k: (i, k)),
            pl.BlockSpec((tk, tn), lambda i, j, k: (k, j)),
            pl.BlockSpec((1, tn), lambda i, j, k: (0, j)),
        ],
        out_specs=pl.BlockSpec((tm, tn), lambda i, j, k: (i, j)),
        compiler_params=pltpu.CompilerParams(
            dimension_semantics=("parallel", "parallel", "arbitrary"),
        ),
    )(xp, w_padded, b_padded)

    return out[:M, :n_out]


@functools.partial(jax.jit, static_argnames=("n_out", "compute_dtype"))
def _xla_linear(x, w_padded, b_padded, *, n_out, compute_dtype):
    """Small-problem bypass: fused XLA dot (launch overhead dominates there)."""
    M, K = x.shape
    Kp, Np = w_padded.shape
    xp = jnp.pad(x.astype(compute_dtype), ((0, 0), (0, Kp - K)))
    y = jnp.dot(xp, w_padded, preferred_element_type=jnp.float32) + b_padded
    return y[:, :n_out]


class PallasLinear:
    """Pallas TPU equivalent of nn.Linear (the LinearRegression forward)."""

    def __init__(self, weight, bias, *, compute_dtype=jnp.bfloat16,
                 tm=512, tn=512, tk=1024, small_problem_bypass=True):
        weight = jnp.asarray(weight)
        bias = jnp.asarray(bias)
        self.out_features, self.in_features = weight.shape
        self.compute_dtype = compute_dtype
        self.small_problem_bypass = small_problem_bypass
        self.tm = tm
        self.tn, self.tk, Kp, Np = _plan_tiles(
            self.in_features, self.out_features, tn_desired=tn, tk_desired=tk)

        # One-time weight prep, hoisted out of the per-call forward:
        # transpose (N,K) -> (K,N), cast to compute dtype, zero-pad to (Kp,Np).
        self.w_padded = jnp.pad(
            weight.T.astype(compute_dtype),
            ((0, Kp - self.in_features), (0, Np - self.out_features)))
        self.b_padded = jnp.pad(
            bias.astype(jnp.float32),
            (0, Np - self.out_features)).reshape(1, Np)

    def __call__(self, x):
        M, K = x.shape
        assert K == self.in_features, "input feature mismatch"
        Kp, Np = self.w_padded.shape
        tm_eff = min(self.tm, _round_up(M, 8))
        grid = (_round_up(M, tm_eff) // tm_eff, Np // self.tn, Kp // self.tk)

        if self.small_problem_bypass and grid == (1, 1, 1):
            return _xla_linear(x, self.w_padded, self.b_padded,
                               n_out=self.out_features,
                               compute_dtype=self.compute_dtype)
        return _pallas_linear(x, self.w_padded, self.b_padded,
                              tm=tm_eff, tn=self.tn, tk=self.tk,
                              n_out=self.out_features,
                              compute_dtype=self.compute_dtype)


if __name__ == "__main__":
    # ---- Case 1: small shapes consistent with nn.Linear(input_dim, output_dim)
    batch, input_dim, output_dim = 8, 32, 16
    key = jax.random.PRNGKey(0)
    kx, kw, kb = jax.random.split(key, 3)

    bound = 1.0 / math.sqrt(input_dim)          # PyTorch default init range
    weight = jax.random.uniform(kw, (output_dim, input_dim), jnp.float32,
                                minval=-bound, maxval=bound)
    bias = jax.random.uniform(kb, (output_dim,), jnp.float32,
                              minval=-bound, maxval=bound)
    x = jax.random.normal(kx, (batch, input_dim), jnp.float32)

    # Bypass disabled so the Pallas kernel itself is exercised on this shape.
    lin = PallasLinear(weight, bias, small_problem_bypass=False)
    y = jax.block_until_ready(lin(x))
    assert y.shape == (batch, output_dim)

    # Reference A: matched bf16-operand / f32-accumulate dot (tight tolerance).
    y_ref_bf16 = (jnp.dot(x.astype(jnp.bfloat16),
                          weight.T.astype(jnp.bfloat16),
                          preferred_element_type=jnp.float32) + bias)
    assert jnp.allclose(y, y_ref_bf16, atol=1e-4, rtol=1e-4)
    # Reference B: full f32 math (loose tolerance, bf16 operand rounding).
    y_ref_f32 = jnp.dot(x, weight.T,
                        precision=jax.lax.Precision.HIGHEST) + bias
    assert jnp.allclose(y, y_ref_f32, atol=3e-2, rtol=3e-2)

    # The small-problem XLA bypass path must agree as well.
    lin_bp = PallasLinear(weight, bias, small_problem_bypass=True)
    y_bp = jax.block_until_ready(lin_bp(x))
    assert jnp.allclose(y_bp, y_ref_bf16, atol=1e-4, rtol=1e-4)

    # ---- Case 2: non-aligned multi-tile shapes exercising the K-accumulation
    # path, minimal-K padding (1100 -> 1152) and the >=2-N-block parallelism.
    M2, K2, N2 = 264, 1100, 384
    k2x, k2w, k2b = jax.random.split(jax.random.PRNGKey(1), 3)
    x2 = jax.random.normal(k2x, (M2, K2), jnp.float32)
    w2 = jax.random.normal(k2w, (N2, K2), jnp.float32) * 0.02
    b2 = jax.random.normal(k2b, (N2,), jnp.float32)

    lin2 = PallasLinear(w2, b2)
    y2 = jax.block_until_ready(lin2(x2))
    assert y2.shape == (M2, N2)

    y2_ref_bf16 = (jnp.dot(x2.astype(jnp.bfloat16),
                           w2.T.astype(jnp.bfloat16),
                           preferred_element_type=jnp.float32) + b2)
    assert jnp.allclose(y2, y2_ref_bf16, atol=2e-4, rtol=2e-4)
    y2_ref_f32 = jnp.dot(x2, w2.T, precision=jax.lax.Precision.HIGHEST) + b2
    assert jnp.max(jnp.abs(y2 - y2_ref_f32)) < 5e-2

    print("KERNEL_OK")
</pallas_src>

<mosaic_0001>
module attributes {stable_mosaic.version = 11 : i64} {
  func.func @_linear_kernel(%arg0: i32, %arg1: i32, %arg2: i32, %arg3: memref<8x128xbf16, #tpu.memory_space<vmem>>, %arg4: memref<128x128xbf16, #tpu.memory_space<vmem>>, %arg5: memref<1x128xf32, #tpu.memory_space<vmem>>, %arg6: memref<8x128xf32, #tpu.memory_space<vmem>>) attributes {dimension_semantics = [#tpu.dimension_semantics<parallel>, #tpu.dimension_semantics<parallel>, #tpu.dimension_semantics<arbitrary>], iteration_bounds = array<i64: 1, 1, 1>, scalar_prefetch = 0 : i64, scratch_operands = 0 : i64, tpu.core_type = #tpu.core_type<tc>, window_params = [{transform_indices = @transform_0, window_bounds = array<i64: 8, 128>}, {transform_indices = @transform_1, window_bounds = array<i64: 128, 128>}, {transform_indices = @transform_2, window_bounds = array<i64: 1, 128>}, {transform_indices = @transform_3, window_bounds = array<i64: 8, 128>}]} {
    %c0_i32 = arith.constant 0 : i32
    %0 = arith.cmpi eq, %arg2, %c0_i32 : i32
    %1 = arith.extui %0 : i1 to i32
    %c0_i32_0 = arith.constant 0 : i32
    %2 = arith.cmpi ne, %1, %c0_i32_0 : i32
    scf.if %2 {
      %cst_10 = arith.constant 0.000000e+00 : f32
      %12 = vector.broadcast %cst_10 : f32 to vector<8x128xf32>
      %c0_11 = arith.constant 0 : index
      %c0_12 = arith.constant 0 : index
      %13 = vector.load %arg6[%c0_11, %c0_12] : memref<8x128xf32, #tpu.memory_space<vmem>>, vector<8x128xf32>
      tpu.vector_store %arg6[%c0_11, %c0_12], %12 {strides = array<i32>} : memref<8x128xf32, #tpu.memory_space<vmem>>, vector<8x128xf32>,
    } else {
    }
    %c0 = arith.constant 0 : index
    %c0_1 = arith.constant 0 : index
    %3 = vector.load %arg6[%c0, %c0_1] : memref<8x128xf32, #tpu.memory_space<vmem>>, vector<8x128xf32>
    %c0_2 = arith.constant 0 : index
    %c0_3 = arith.constant 0 : index
    %4 = vector.load %arg3[%c0_2, %c0_3] : memref<8x128xbf16, #tpu.memory_space<vmem>>, vector<8x128xbf16>
    %c0_4 = arith.constant 0 : index
    %c0_5 = arith.constant 0 : index
    %5 = vector.load %arg4[%c0_4, %c0_5] : memref<128x128xbf16, #tpu.memory_space<vmem>>, vector<128x128xbf16>
    %cst = arith.constant dense<0.000000e+00> : vector<8x128xf32>
    %6 = tpu.matmul %4, %5, %cst {dimension_numbers = #tpu.dot_dimension_numbers<[1], [0], [0], [1], [0, 0, 1, 1], [], []>} : vector<8x128xbf16>, vector<128x128xbf16>, vector<8x128xf32> -> vector<8x128xf32>
    %7 = arith.addf %3, %6 : vector<8x128xf32>
    %c0_6 = arith.constant 0 : index
    %c0_7 = arith.constant 0 : index
    %8 = vector.load %arg6[%c0_6, %c0_7] : memref<8x128xf32, #tpu.memory_space<vmem>>, vector<8x128xf32>
    tpu.vector_store %arg6[%c0_6, %c0_7], %7 {strides = array<i32>} : memref<8x128xf32, #tpu.memory_space<vmem>>, vector<8x128xf32>,
    %c0_i32_8 = arith.constant 0 : i32
    %9 = arith.cmpi eq, %arg2, %c0_i32_8 : i32
    %10 = arith.extui %9 : i1 to i32
    %c0_i32_9 = arith.constant 0 : i32
    %11 = arith.cmpi ne, %10, %c0_i32_9 : i32
    scf.if %11 {
      %c0_10 = arith.constant 0 : index
      %c0_11 = arith.constant 0 : index
      %12 = vector.load %arg6[%c0_10, %c0_11] : memref<8x128xf32, #tpu.memory_space<vmem>>, vector<8x128xf32>
      %c0_12 = arith.constant 0 : index
      %c0_13 = arith.constant 0 : index
      %13 = vector.load %arg5[%c0_12, %c0_13] : memref<1x128xf32, #tpu.memory_space<vmem>>, vector<1x128xf32>
      %14 = vector.broadcast %13 : vector<1x128xf32> to vector<8x128xf32>
      %15 = arith.addf %12, %14 : vector<8x128xf32>
      %c0_14 = arith.constant 0 : index
      %c0_15 = arith.constant 0 : index
      %16 = vector.load %arg6[%c0_14, %c0_15] : memref<8x128xf32, #tpu.memory_space<vmem>>, vector<8x128xf32>
      tpu.vector_store %arg6[%c0_14, %c0_15], %15 {strides = array<i32>} : memref<8x128xf32, #tpu.memory_space<vmem>>, vector<8x128xf32>,
    } else {
    }
    return
  }
  func.func @transform_0(%arg0: i32, %arg1: i32, %arg2: i32) -> (i32, i32) {
    %c0_i32 = arith.constant 0 : i32
    return %arg0, %arg2 : i32, i32
  }
  func.func @transform_1(%arg0: i32, %arg1: i32, %arg2: i32) -> (i32, i32) {
    %c0_i32 = arith.constant 0 : i32
    return %arg2, %arg1 : i32, i32
  }
  func.func @transform_2(%arg0: i32, %arg1: i32, %arg2: i32) -> (i32, i32) {
    %c0_i32 = arith.constant 0 : i32
    %c0_i32_0 = arith.constant 0 : i32
    return %c0_i32, %arg1 : i32, i32
  }
  func.func @transform_3(%arg0: i32, %arg1: i32, %arg2: i32) -> (i32, i32) {
    %c0_i32 = arith.constant 0 : i32
    return %arg0, %arg1 : i32, i32
  }
}

</mosaic_0001>

<bundles_post_ra>
// kernel: _pallas_linear.1
= control target key start
LH: loop header
LB: loop body
LE: loop exit
PB: predicated region body
PF: predicated region fallthrough
CT: control target
= control target key end

     0   :  { %8 = vsyncpa [#allocation3], 0  ;;  %s305_s0 = inlined_call_operand.vmem [shape: bf16[8,128], index: 0, kind: input, shape index: {}]   ;;  %s306_s1 = inlined_call_operand.hbm [shape: bf16[128,128], index: 1, kind: input, shape index: {}]   ;;  %s307_s2 = inlined_call_operand.vmem [shape: f32[1,128], index: 2, kind: input, shape index: {}]   ;;  %s308_s3 = inlined_call_operand.hbm [shape: f32[8,128], index: 3, kind: output, shape index: {}]  }
   0x1   :  { %9 = vsyncpa [#allocation4], 0  ;;  %s267_s12 = smov [#allocation2]  }
   0x2   :  { %s17_s13 = sshll.u32 %s267_s12, 4  ;;  %s18_s13 = int_to_ptr.vmem [resolvable:$true] %s17_s13 }
   0x3   :  { %s231_s14 = scalar_lea.vmem %s18_s13, 1024  ;;  %p236_p1 = scmp.lt.s32.totalorder %s18_s13, %s18_s13 }
   0x4   :  { %p232_p0 = scmp.ne.s32.totalorder %s18_s13, %s231_s14  ;;  %p237_p2 = scmp.lt.s32.totalorder %s231_s14, %s231_s14 }
   0x6   :  { %p238_p3 = por %p237_p2, %p236_p1 }
   0x8   :  { %p239_p4 = pnand %p238_p3, %p232_p0 }
   0xa   :  { %242 = shalt.err (!%p239_p4)
}
   0xb   :  { %s268_s15 = smov 64   ;;  %s269_s16 = smov 4  }
   0xc   :  { %23 = dma.hbm_to_vmem [thread:$0]  %s306_s1, 1024, %s18_s13, [#allocation3], %s268_s15, %s268_s15, %s269_s16  }
   0xd   :  { %263 = dma.done.wait [#allocation3], 1024  }
   0xe   :  { %264 = vsyncadd [#allocation3], 4294966272  ;;  %v270_v0 = vmov 0.0   ;;  %vm271_vm0 = vmmov 0   ;;  %v215_v1 = vld [vmem:[#allocation2 + $0x38] sm:$0xff]   ;;  %v216_v2 = vld [vmem:[#allocation2 + $0x30] sm:$0xff]  }
   0xf   :  { %189 = vmatprep.subr.bf16.mxu0 %v270_v0  ;;  %205 = vmatprep.mubr.msk.bf16.mxu0 %vm271_vm0, %v270_v0  ;;  %v217_v3 = vld [vmem:[#allocation2 + $0x28] sm:$0xff]   ;;  %v218_v4 = vld [vmem:[#allocation2 + $0x20] sm:$0xff]   ;;  %v219_v5 = vld [vmem:[#allocation2 + $0x18] sm:$0xff]   ;;  %s272_s22 = smov [#allocation5]  }
  0x10   :  { %190 = vmatpush3.bf16.msra.mxu0 %v215_v1  ;;  %v220_v6 = vld [vmem:[#allocation2 + $0x10] sm:$0xff]   ;;  %v221_v7 = vld [vmem:[#allocation2 + $0x8] sm:$0xff]   ;;  %v222_v8 = vld [vmem:[#allocation2] sm:$0xff]   ;;  %s162_s23 = sshll.u32 %s272_s22, 4  ;;  %s163_s23 = int_to_ptr.vmem [resolvable:$true] %s162_s23 }
  0x11   :  { %191 = vmatprep.subr.bf16.mxu0 %v270_v0  ;;  %v36_v9 = vld [vmem:[%s305_s0] sm:$0xf]  ;;  %s243_s24 = scalar_lea.vmem %s163_s23, 128  ;;  %p248_p6 = scmp.lt.s32.totalorder %s163_s23, %s163_s23 }
  0x12   :  { %v179_v11 = vld [vmem:[%s307_s2] ss:$0 sm:$0xff]  ;;  %p244_p5 = scmp.ne.s32.totalorder %s163_s23, %s243_s24  ;;  %p249_p7 = scmp.lt.s32.totalorder %s243_s24, %s243_s24 }
  0x14   :  { %192 = vmatpush3.bf16.msra.mxu0 %v216_v2  ;;  %p250_p8 = por %p249_p7, %p248_p6 }
  0x15   :  { %193 = vmatprep.subr.bf16.mxu0 %v270_v0 }
  0x16   :  { %p251_p9 = pnand %p250_p8, %p244_p5 }
  0x18   :  { %194 = vmatpush3.bf16.msra.mxu0 %v217_v3 }
  0x19   :  { %195 = vmatprep.subr.bf16.mxu0 %v270_v0 }
  0x1c   :  { %196 = vmatpush3.bf16.msra.mxu0 %v218_v4 }
  0x1d   :  { %197 = vmatprep.subr.bf16.mxu0 %v270_v0 }
  0x20   :  { %198 = vmatpush3.bf16.msra.mxu0 %v219_v5 }
  0x21   :  { %199 = vmatprep.subr.bf16.mxu0 %v270_v0 }
  0x24   :  { %200 = vmatpush3.bf16.msra.mxu0 %v220_v6 }
  0x25   :  { %201 = vmatprep.subr.bf16.mxu0 %v270_v0 }
  0x28   :  { %202 = vmatpush3.bf16.msra.mxu0 %v221_v7 }
  0x29   :  { %203 = vmatprep.subr.bf16.mxu0 %v270_v0 }
  0x2c   :  { %204 = vmatpush3.bf16.msra.mxu0 %v222_v8 }
  0x2f   :  { %206 = vmatmul.mubr.bf16.vlgmr.msra.gmra.mxu0 %v36_v9 }
  0xef   :  { %v135_v10 = vpop.f32.mrf.mxu0 }
  0xf0   :  { %v154_v13 = vadd.f32 %v179_v11, %v135_v10 }
  0xf1   :  { %v207_v12 = vpop.f32.mrf.mxu0 }
  0xf2   :  { %155 = vst [vmem:[#allocation5] sm:$0xff] %v154_v13 }
  0xf3   :  { %v138_v14 = vpop.f32.mrf.mxu0 }
  0xf5   :  { %v208_v15 = vpop.f32.mrf.mxu0 }
  0xf6   :  { %254 = shalt.err (!%p251_p9)
}
  0xf7   :  { %165 = dma.vmem_to_hbm [thread:$0]  %s163_s23, 128, %s308_s3, [#allocation4]  }
  0xf8   :  { %265 = dma.done.wait [#allocation4], 128  }
  0xf9   :  { %266 = vsyncadd [#allocation4], 4294967168 }
  0xfa   :  { %169 = vsyncpa [#allocation3], 1 }
  0xfb   :  { %170 = vsyncpa [#allocation4], 1 }

</bundles_post_ra>
